<compile_context>
chip_gen: v7x
topology: tpu7x:2x2x1
jax: 0.10.0
libtpu: 0.0.40
codegen_flags: <defaults>
</compile_context>

<pallas_src>
import jax
import jax.numpy as jnp
from jax.experimental import pallas as pl
from jax.experimental.pallas import tpu as pltpu


def _round_up(v, m):
    return ((v + m - 1) // m) * m


def _pad_lanes(n):
    """Pad a last-dim (lane) width to a multiple of 128 for unmasked vector
    stores, unless doing so would at least double HBM output traffic."""
    p = _round_up(n, 128)
    return p if (p - n) < n else n


def _pad_cols(m, width):
    return m if m.shape[1] == width else jnp.pad(m, ((0, 0), (0, width - m.shape[1])))


def _dynsys_kernel(x_ref, u_ref, wa_ref, wb_ref, wc_ref, dx_ref, y_ref):
    # Three small MXU pushes on the same resident tiles; f32 accumulation,
    # cast at the store. MXU has large slack here (kernel is memory-bound),
    # so the extra push vs. a pre-fused [x|u]@W is free and avoids the
    # wrapper-side activation concat.
    x = x_ref[...]
    u = u_ref[...]
    dx = jnp.dot(x, wa_ref[...], preferred_element_type=jnp.float32)
    dx = dx + jnp.dot(u, wb_ref[...], preferred_element_type=jnp.float32)
    y = jnp.dot(x, wc_ref[...], preferred_element_type=jnp.float32)
    dx_ref[...] = dx.astype(dx_ref.dtype)
    y_ref[...] = y.astype(y_ref.dtype)


def dynamical_system_forward(x, u, mat_a, mat_b, mat_c, *, tile_m=512,
                             use_bf16=False):
    """Pallas wrapper. Returns (y, dx) matching the PyTorch module."""
    batch, n_states = x.shape
    n_inputs = u.shape[1]
    n_outputs = mat_c.shape[1]
    assert mat_a.shape == (n_states, n_states)
    assert mat_b.shape == (n_states, n_inputs)
    assert mat_c.shape == (n_states, n_outputs)

    # Weight dtype is taken from the parameters (explicit), never from x.
    param_dtype = mat_a.dtype
    compute_dtype = jnp.bfloat16 if use_bf16 else param_dtype
    out_dtype = x.dtype
    sublane = 16 if compute_dtype == jnp.bfloat16 else 8

    # Weights, transposed once in the wrapper (parameter-side, amortized) and
    # zero-padded on their output (lane) dim only when lane-dense stores pay.
    ndx_pad = _pad_lanes(n_states)
    ny_pad = _pad_lanes(n_outputs)
    wa = _pad_cols(mat_a.T, ndx_pad).astype(compute_dtype)   # (S, ndx_pad)
    wb = _pad_cols(mat_b.T, ndx_pad).astype(compute_dtype)   # (I, ndx_pad)
    wc = _pad_cols(mat_c, ny_pad).astype(compute_dtype)      # (S, ny_pad)

    # Activations: cast only if needed; pad the batch only to the sublane
    # multiple (NOT to a multiple of tm).
    x_c = x if x.dtype == compute_dtype else x.astype(compute_dtype)
    u_c = u if u.dtype == compute_dtype else u.astype(compute_dtype)
    padded_batch = _round_up(batch, sublane)
    if padded_batch != batch:
        x_c = jnp.pad(x_c, ((0, padded_batch - batch), (0, 0)))
        u_c = jnp.pad(u_c, ((0, padded_batch - batch), (0, 0)))

    # Row-tile selection: big tiles, but split so the grid has >= 2 steps when
    # the batch is large enough (keeps v7x's 2nd TensorCore busy and avoids a
    # mostly-padding last tile). A partial last tile is fine: its out-of-range
    # output rows are masked on store and discarded by the wrapper.
    tm = min(_round_up(tile_m, sublane), padded_batch)
    if tm < padded_batch <= 2 * tm:
        tm = _round_up(pl.cdiv(padded_batch, 2), sublane)
    grid = (pl.cdiv(padded_batch, tm),)

    # VMEM budget: double-buffered activation/output tiles + (double-buffered)
    # resident weights, with headroom. Keeps us inside v7x's 64 MiB physical
    # VMEM and above v5e's 16 MiB default scoped limit.
    csize = jnp.dtype(compute_dtype).itemsize
    osize = jnp.dtype(out_dtype).itemsize
    needed = (2 * tm * (n_states + n_inputs) * csize
              + 2 * tm * (ndx_pad + ny_pad) * osize
              + 2 * (n_states * ndx_pad + n_inputs * ndx_pad
                     + n_states * ny_pad) * csize)
    vmem_limit = int(min(max(2 * needed, 32 << 20), 48 << 20))

    cost = pl.CostEstimate(
        flops=2 * padded_batch * (n_states * (ndx_pad + ny_pad)
                                  + n_inputs * ndx_pad),
        transcendentals=0,
        bytes_accessed=(padded_batch * (n_states + n_inputs) * csize
                        + (n_states + n_inputs) * ndx_pad * csize
                        + n_states * ny_pad * csize
                        + padded_batch * (ndx_pad + ny_pad) * osize),
    )

    dx_out, y_out = pl.pallas_call(
        _dynsys_kernel,
        out_shape=(
            jax.ShapeDtypeStruct((padded_batch, ndx_pad), out_dtype),
            jax.ShapeDtypeStruct((padded_batch, ny_pad), out_dtype),
        ),
        grid=grid,
        in_specs=[
            # Activations: stream one row-tile per grid step.
            pl.BlockSpec((tm, n_states), lambda i: (i, 0)),
            pl.BlockSpec((tm, n_inputs), lambda i: (i, 0)),
            # Weights: constant block index -> resident in VMEM across steps.
            pl.BlockSpec((n_states, ndx_pad), lambda i: (0, 0)),
            pl.BlockSpec((n_inputs, ndx_pad), lambda i: (0, 0)),
            pl.BlockSpec((n_states, ny_pad), lambda i: (0, 0)),
        ],
        out_specs=(
            pl.BlockSpec((tm, ndx_pad), lambda i: (i, 0)),
            pl.BlockSpec((tm, ny_pad), lambda i: (i, 0)),
        ),
        compiler_params=pltpu.CompilerParams(
            dimension_semantics=("parallel",),
            vmem_limit_bytes=vmem_limit,
        ),
        cost_estimate=cost,
    )(x_c, u_c, wa, wb, wc)

    # Only slice when padding actually happened (slices are extra HBM passes).
    dx = (dx_out if (padded_batch == batch and ndx_pad == n_states)
          else dx_out[:batch, :n_states])
    y = (y_out if (padded_batch == batch and ny_pad == n_outputs)
         else y_out[:batch, :n_outputs])
    return y, dx


if __name__ == "__main__":
    # Small, deterministic problem: 16 states, 4 inputs, 8 outputs, batch 8.
    batch, n_states, n_inputs, n_outputs = 8, 16, 4, 8

    key = jax.random.PRNGKey(0)
    kx, ku, ka, kb, kc = jax.random.split(key, 5)

    x = jax.random.normal(kx, (batch, n_states), dtype=jnp.float32)
    u = jax.random.normal(ku, (batch, n_inputs), dtype=jnp.float32)

    # Deterministic "parameters" (stand-ins for the nn.Parameter tensors).
    mat_a = 0.1 * jax.random.normal(ka, (n_states, n_states), dtype=jnp.float32)
    mat_b = 0.1 * jax.random.normal(kb, (n_states, n_inputs), dtype=jnp.float32)
    mat_c = 0.1 * jax.random.normal(kc, (n_states, n_outputs), dtype=jnp.float32)

    y, dx = dynamical_system_forward(x, u, mat_a, mat_b, mat_c)
    jax.block_until_ready((y, dx))

    # Pure-JAX reference check.
    y_ref = x @ mat_c
    dx_ref = x @ mat_a.T + u @ mat_b.T
    assert y.shape == (batch, n_outputs) and dx.shape == (batch, n_states)
    assert jnp.allclose(y, y_ref, atol=1e-5, rtol=1e-5)
    assert jnp.allclose(dx, dx_ref, atol=1e-5, rtol=1e-5)

    print("KERNEL_OK")
</pallas_src>

<mosaic_0001>
module attributes {stable_mosaic.version = 11 : i64} {
  func.func @_dynsys_kernel(%arg0: i32, %arg1: memref<8x16xf32, #tpu.memory_space<vmem>>, %arg2: memref<8x4xf32, #tpu.memory_space<vmem>>, %arg3: memref<16x16xf32, #tpu.memory_space<vmem>>, %arg4: memref<4x16xf32, #tpu.memory_space<vmem>>, %arg5: memref<16x8xf32, #tpu.memory_space<vmem>>, %arg6: memref<8x16xf32, #tpu.memory_space<vmem>>, %arg7: memref<8x8xf32, #tpu.memory_space<vmem>>) attributes {dimension_semantics = [#tpu.dimension_semantics<parallel>], iteration_bounds = array<i64: 1>, scalar_prefetch = 0 : i64, scratch_operands = 0 : i64, tpu.core_type = #tpu.core_type<tc>, window_params = [{transform_indices = @transform_0, window_bounds = array<i64: 8, 16>}, {transform_indices = @transform_1, window_bounds = array<i64: 8, 4>}, {pipeline_mode = #tpu.pipeline_mode<synchronous>, transform_indices = @transform_2, window_bounds = array<i64: 16, 16>}, {pipeline_mode = #tpu.pipeline_mode<synchronous>, transform_indices = @transform_3, window_bounds = array<i64: 4, 16>}, {pipeline_mode = #tpu.pipeline_mode<synchronous>, transform_indices = @transform_4, window_bounds = array<i64: 16, 8>}, {transform_indices = @transform_5, window_bounds = array<i64: 8, 16>}, {transform_indices = @transform_6, window_bounds = array<i64: 8, 8>}]} {
    %c0 = arith.constant 0 : index
    %c0_0 = arith.constant 0 : index
    %0 = vector.load %arg1[%c0, %c0_0] : memref<8x16xf32, #tpu.memory_space<vmem>>, vector<8x16xf32>
    %c0_1 = arith.constant 0 : index
    %c0_2 = arith.constant 0 : index
    %1 = vector.load %arg2[%c0_1, %c0_2] : memref<8x4xf32, #tpu.memory_space<vmem>>, vector<8x4xf32>
    %c0_3 = arith.constant 0 : index
    %c0_4 = arith.constant 0 : index
    %2 = vector.load %arg3[%c0_3, %c0_4] : memref<16x16xf32, #tpu.memory_space<vmem>>, vector<16x16xf32>
    %cst = arith.constant dense<0.000000e+00> : vector<8x16xf32>
    %3 = tpu.matmul %0, %2, %cst {dimension_numbers = #tpu.dot_dimension_numbers<[1], [0], [0], [1], [0, 0, 1, 1], [], []>} : vector<8x16xf32>, vector<16x16xf32>, vector<8x16xf32> -> vector<8x16xf32>
    %c0_5 = arith.constant 0 : index
    %c0_6 = arith.constant 0 : index
    %4 = vector.load %arg4[%c0_5, %c0_6] : memref<4x16xf32, #tpu.memory_space<vmem>>, vector<4x16xf32>
    %cst_7 = arith.constant dense<0.000000e+00> : vector<8x16xf32>
    %5 = tpu.matmul %1, %4, %cst_7 {dimension_numbers = #tpu.dot_dimension_numbers<[1], [0], [0], [1], [0, 0, 1, 1], [], []>} : vector<8x4xf32>, vector<4x16xf32>, vector<8x16xf32> -> vector<8x16xf32>
    %6 = arith.addf %3, %5 : vector<8x16xf32>
    %c0_8 = arith.constant 0 : index
    %c0_9 = arith.constant 0 : index
    %7 = vector.load %arg5[%c0_8, %c0_9] : memref<16x8xf32, #tpu.memory_space<vmem>>, vector<16x8xf32>
    %cst_10 = arith.constant dense<0.000000e+00> : vector<8x8xf32>
    %8 = tpu.matmul %0, %7, %cst_10 {dimension_numbers = #tpu.dot_dimension_numbers<[1], [0], [0], [1], [0, 0, 1, 1], [], []>} : vector<8x16xf32>, vector<16x8xf32>, vector<8x8xf32> -> vector<8x8xf32>
    %c0_11 = arith.constant 0 : index
    %c0_12 = arith.constant 0 : index
    %9 = vector.load %arg6[%c0_11, %c0_12] : memref<8x16xf32, #tpu.memory_space<vmem>>, vector<8x16xf32>
    tpu.vector_store %arg6[%c0_11, %c0_12], %6 {strides = array<i32>} : memref<8x16xf32, #tpu.memory_space<vmem>>, vector<8x16xf32>,
    %c0_13 = arith.constant 0 : index
    %c0_14 = arith.constant 0 : index
    %10 = vector.load %arg7[%c0_13, %c0_14] : memref<8x8xf32, #tpu.memory_space<vmem>>, vector<8x8xf32>
    tpu.vector_store %arg7[%c0_13, %c0_14], %8 {strides = array<i32>} : memref<8x8xf32, #tpu.memory_space<vmem>>, vector<8x8xf32>,
    return
  }
  func.func @transform_0(%arg0: i32) -> (i32, i32) {
    %c0_i32 = arith.constant 0 : i32
    %c0_i32_0 = arith.constant 0 : i32
    return %arg0, %c0_i32 : i32, i32
  }
  func.func @transform_1(%arg0: i32) -> (i32, i32) {
    %c0_i32 = arith.constant 0 : i32
    %c0_i32_0 = arith.constant 0 : i32
    return %arg0, %c0_i32 : i32, i32
  }
  func.func @transform_2(%arg0: i32) -> (i32, i32) {
    %c0_i32 = arith.constant 0 : i32
    %c0_i32_0 = arith.constant 0 : i32
    %c0_i32_1 = arith.constant 0 : i32
    return %c0_i32, %c0_i32_0 : i32, i32
  }
  func.func @transform_3(%arg0: i32) -> (i32, i32) {
    %c0_i32 = arith.constant 0 : i32
    %c0_i32_0 = arith.constant 0 : i32
    %c0_i32_1 = arith.constant 0 : i32
    return %c0_i32, %c0_i32_0 : i32, i32
  }
  func.func @transform_4(%arg0: i32) -> (i32, i32) {
    %c0_i32 = arith.constant 0 : i32
    %c0_i32_0 = arith.constant 0 : i32
    %c0_i32_1 = arith.constant 0 : i32
    return %c0_i32, %c0_i32_0 : i32, i32
  }
  func.func @transform_5(%arg0: i32) -> (i32, i32) {
    %c0_i32 = arith.constant 0 : i32
    %c0_i32_0 = arith.constant 0 : i32
    return %arg0, %c0_i32 : i32, i32
  }
  func.func @transform_6(%arg0: i32) -> (i32, i32) {
    %c0_i32 = arith.constant 0 : i32
    %c0_i32_0 = arith.constant 0 : i32
    return %arg0, %c0_i32 : i32, i32
  }
}

</mosaic_0001>

<bundles_post_ra>
// kernel: tpu_custom_call.1
= control target key start
LH: loop header
LB: loop body
LE: loop exit
PB: predicated region body
PF: predicated region fallthrough
CT: control target
= control target key end

     0   :  { %12 = vsyncpa [#allocation3], 0  ;;  %vm33_vm0 = vcmask 1043456   ;;  %v376_v2 = vmov 0.0   ;;  %vm377_vm1 = vmmov 0   ;;  %vm29_vm2 = vcmask 31744   ;;  %s474_s0 = inlined_call_operand.vmem [shape: f32[8,16], index: 0, kind: input, shape index: {}]   ;;  %s475_s1 = inlined_call_operand.vmem [shape: f32[8,4], index: 1, kind: input, shape index: {}]   ;;  %s476_s2 = inlined_call_operand.vmem [shape: f32[16,16], index: 2, kind: input, shape index: {}]   ;;  %s477_s3 = inlined_call_operand.vmem [shape: f32[4,16], index: 3, kind: input, shape index: {}]   ;;  %s478_s4 = inlined_call_operand.vmem [shape: f32[16,8], index: 4, kind: input, shape index: {}]   ;;  %s479_s5 = inlined_call_operand.hbm [shape: f32[8,16], index: 5, kind: output, shape index: {0}]   ;;  %s480_s6 = inlined_call_operand.hbm [shape: f32[8,8], index: 6, kind: output, shape index: {1}]  }
   0x1   :  { %v28_v0 = vld [vmem:[%s477_s3] sm:$0xf]  ;;  %296 = vmatprep.subr.mxu0 %v376_v2  ;;  %298 = vmatprep.mubr.msk.f32.mxu0 %vm377_vm1, %v376_v2  ;;  %v27_v4 = vld [vmem:[%s476_s2 + $0x8] sm:$0xff]  ;;  %v378_v7 = vmov 0.0|0.0  }
   0x2   :  { %v25_v1 = vld [vmem:[%s475_s1] sm:$0xff]  ;;  %297 = vmatpush3.msk.msra.mxu0 %vm33_vm0, %v28_v0  ;;  %318 = vmatprep.subr.bf16.mxu1 %v378_v7  ;;  %v182_v8 = vld [vmem:[%s478_s4 + $0x8] sm:$0xff] }
   0x3   :  { %v26_v3 = vld [vmem:[%s476_s2] sm:$0xff] }
   0x4   :  { %v181_v5 = vld [vmem:[%s478_s4] sm:$0xff]  ;;  %v316_v6 = vpack.c.bf16 %v27_v4, %v26_v3 }
   0x5   :  { %13 = vsyncpa [#allocation5], 0  ;;  %299 = vmatmul.mubr.msk.f32.vlgmr.msra.gmra.mrb[0].mxu0 %vm29_vm2, %v25_v1  ;;  %315 = vmatprep.subr.bf16.mxu0 %v378_v7  ;;  %v319_v9 = vpack.c.bf16 %v182_v8, %v181_v5  ;;  %v24_v10 = vld [vmem:[%s474_s0] sm:$0xff]  ;;  %vm107_vm3 = vcmask 130048   ;;  %s379_s4 = smov [#allocation4]   ;;  %vm254_vm4 = vcmask 64512  }
   0x6   :  { %317 = vmatpush3.bf16.msra.mxu0 %v316_v6  ;;  %305 = vmatprep.mubr.msk.f32.mxu0 %vm377_vm1, %v376_v2  ;;  %s272_s8 = sshll.u32 %s379_s4, 4  ;;  %s380_s9 = smov [#allocation2]   ;;  %s273_s8 = int_to_ptr.vmem [resolvable:$true] %s272_s8 }
   0x7   :  { %320 = vmatpush3.bf16.msra.mxu1 %v319_v9  ;;  %312 = vmatprep.mubr.msk.f32.mxu1 %vm377_vm1, %v376_v2  ;;  %s262_s10 = sshll.u32 %s380_s9, 4  ;;  %s328_s11 = scalar_lea.vmem %s273_s8, 128  ;;  %s442_s10 = int_to_ptr.vmem [resolvable:$true] %s262_s10 }
   0x8   :  { %p329_p0 = scmp.ne.s32.totalorder %s273_s8, %s328_s11  ;;  %p333_p1 = scmp.lt.s32.totalorder %s273_s8, %s273_s8 }
   0x9   :  { %p334_p2 = scmp.lt.s32.totalorder %s328_s11, %s328_s11 }
   0xa   :  { %313 = vmatmul.mubr.msk.f32.vlgmr.msra.gmra.mrb[0].mxu1 %vm107_vm3, %v24_v10 }
   0xb   :  { %p335_p3 = por %p334_p2, %p333_p1 }
   0xd   :  { %306 = vmatmul.mubr.msk.f32.vlgmr.msra.gmra.mrb[0].mxu0 %vm107_vm3, %v24_v10  ;;  %p336_p4 = pnand %p335_p3, %p329_p0 }
  0xdd   :  { %v249_v11 = vpop.f32.mrb[0].mxu1 }
  0xde   :  { %255 = vst.msk [vmem:[#allocation4] sm:$0xff] %vm254_vm4, %v249_v11  ;;  %v314_v12 = vpop.f32.mrb[1].mxu1 }
  0xdf   :  { %339 = shalt.err (!%p336_p4)
}
  0xe0   :  { %s340_s13 = scalar_lea.hbm %s480_s6, 128 }
  0xe1   :  { %p341_p5 = scmp.ne.s32.totalorder %s480_s6, %s340_s13  ;;  %p344_p6 = scmp.lt.u32.totalorder %s340_s13, %s480_s6 }
  0xe3   :  { %p346_p7 = pnand %p344_p6, %p341_p5 }
  0xe5   :  { %349 = shalt.err (!%p346_p7)
}
  0xe6   :  { %275 = dma.vmem_to_hbm [thread:$0]  %s273_s8, 128, %s480_s6, [#allocation5]   ;;  %v177_v13 = vpop.f32.mrb[0].mxu0 }
  0xe7   :  { %253 = vst.msk [vmem:[#allocation2] sm:$0xff] %vm107_vm3, %v177_v13  ;;  %v307_v14 = vpop.f32.mrb[1].mxu0  ;;  %s350_s20 = scalar_lea.vmem %s442_s10, 128  ;;  %p355_p9 = scmp.lt.s32.totalorder %s442_s10, %s442_s10 }
  0xe8   :  { %p351_p8 = scmp.ne.s32.totalorder %s442_s10, %s350_s20  ;;  %p356_p10 = scmp.lt.s32.totalorder %s350_s20, %s350_s20 }
  0xea   :  { %p357_p11 = por %p356_p10, %p355_p9 }
  0xec   :  { %p358_p12 = pnand %p357_p11, %p351_p8 }
  0xee   :  { %361 = shalt.err (!%p358_p12)
}
  0xef   :  { %s362_s23 = scalar_lea.hbm %s479_s5, 128 }
  0xf0   :  { %p363_p13 = scmp.ne.s32.totalorder %s479_s5, %s362_s23  ;;  %p366_p0 = scmp.lt.u32.totalorder %s362_s23, %s479_s5 }
  0xf2   :  { %p368_p1 = pnand %p366_p0, %p363_p13 }
  0xf4   :  { %371 = shalt.err (!%p368_p1)
}
  0xf5   :  { %265 = dma.vmem_to_hbm [thread:$0]  %s442_s10, 128, %s479_s5, [#allocation3]  }
  0xf6   :  { %372 = dma.done.wait [#allocation3], 128  }
  0xf7   :  { %373 = vsyncadd [#allocation3], 4294967168 }
  0xf8   :  { %374 = dma.done.wait [#allocation5], 128  }
  0xf9   :  { %375 = vsyncadd [#allocation5], 4294967168 }
  0xfa   :  { %282 = vsyncpa [#allocation3], 1 }
  0xfb   :  { %283 = vsyncpa [#allocation5], 1 }

</bundles_post_ra>
